<compile_context>
chip_gen: v7x
topology: tpu7x:2x2x1
jax: 0.10.0
libtpu: 0.0.40
codegen_flags: <defaults>
</compile_context>

<pallas_src>
import functools

import jax
import jax.numpy as jnp
import numpy as np
from jax.experimental import pallas as pl
from jax.experimental.pallas import tpu as pltpu


# ----------------------------------------------------------------------------
# Pallas kernel
# ----------------------------------------------------------------------------
def _dilated_residual_kernel(*refs, dilation, ksize, pad, pad8, tile_t, halo_mode):
    """One (batch, time-tile) block of DilatedResidualLayer.forward.

    refs when halo_mode == "neighbors":
      xc, x_left_halo, x_right_halo, w_slab, bd, w1, b1, mask, out
    refs otherwise:
      xc, w_slab, bd, w1, b1, mask, out
    """
    if halo_mode == "neighbors":
        xc_ref, xl_ref, xr_ref, ws_ref, bd_ref, w1_ref, b1_ref, m_ref, o_ref = refs
    else:
        xc_ref, ws_ref, bd_ref, w1_ref, b1_ref, m_ref, o_ref = refs

    xc = xc_ref[0]                                    # (tile_t, C)
    C = xc.shape[-1]

    # Assemble the zero-padded time window [t0 - pad, t0 + tile_t + pad) in VMEM.
    if halo_mode == "none":                           # pad == 0
        window = xc
    elif halo_mode == "zeros":                        # single time tile
        zeros = jnp.zeros((pad, C), xc.dtype)
        window = jnp.concatenate([zeros, xc, zeros], axis=0)
    else:                                             # halo-only neighbour blocks
        t = pl.program_id(1)
        nt = pl.num_programs(1)
        zeros = jnp.zeros((pad, C), xc.dtype)
        left = xl_ref[0][pad8 - pad:, :]              # last `pad` rows of left halo
        right = xr_ref[0][:pad, :]                    # first `pad` rows of right halo
        left = jnp.where(t > 0, left, zeros)          # zero padding at sequence start
        right = jnp.where(t < nt - 1, right, zeros)   # zero padding at sequence end
        window = jnp.concatenate([left, xc, right], axis=0)

    # Fused dilated conv: ONE (tile_t, K*C) @ (K*C, C) MXU matmul over all taps.
    cols = [window[k * dilation:k * dilation + tile_t, :] for k in range(ksize)]
    slab = cols[0] if ksize == 1 else jnp.concatenate(cols, axis=-1)
    h = jnp.dot(slab, ws_ref[...], preferred_element_type=jnp.float32)
    h = jnp.maximum(h + bd_ref[...].astype(jnp.float32), 0.0)          # ReLU

    # conv_1x1 (accumulate in f32; MXU operands keep the caller's dtype).
    out = jnp.dot(h.astype(w1_ref.dtype), w1_ref[...],
                  preferred_element_type=jnp.float32)
    out = out + b1_ref[...].astype(jnp.float32)

    # TODO(synk): nn.Dropout() is identity in eval mode; training-mode dropout
    # (pltpu.prng_seed / prng_random_bits + 1/(1-p) scaling) is not implemented.

    y = (xc.astype(jnp.float32) + out) * m_ref[0].astype(jnp.float32)  # residual*mask
    o_ref[0] = y.astype(o_ref.dtype)


# ----------------------------------------------------------------------------
# Parameter packing (one-time, off the hot path)
# ----------------------------------------------------------------------------
def prepare_layer_params(wd_oik, bd, w1_oi1, b1):
    """Repack PyTorch Conv1d weights.

    wd_oik: (C_out, C_in, K) dilated-conv weight -> slab (K*C_in, C_out)
    w1_oi1: (C_out, C_in, 1) 1x1-conv weight     -> (C_in, C_out)
    """
    c_out, c_in, k = wd_oik.shape
    w_slab = jnp.transpose(wd_oik, (2, 1, 0)).reshape(k * c_in, c_out)
    return {
        "w_slab": w_slab,
        "bd": bd.reshape(1, c_out),
        "w1": jnp.transpose(w1_oi1[:, :, 0]),
        "b1": b1.reshape(1, c_out),
        "ksize": k,
    }


# ----------------------------------------------------------------------------
# Tiling plan (VMEM-budgeted)
# ----------------------------------------------------------------------------
def _vmem_capacity_bytes():
    try:
        return int(pltpu.get_tpu_info().vmem_capacity_bytes)
    except Exception:
        return 64 * 1024 * 1024          # conservative default: v7x per-core VMEM


def _target_rows(C, K, itemsize, vmem_cap):
    """Time rows per grid step, budgeted against VMEM."""
    # Per-row bytes: double-buffered pipeline blocks (x center, out, mask)
    # plus f32 compute intermediates (window/tap slab, h, out, y).
    pipeline = 2 * (2 * C + 1) * itemsize
    compute = (2 * K + 4) * C * 4
    budget = int(vmem_cap * 0.40)
    rows = budget // max(1, pipeline + compute)
    rows = max(512, min(rows, 8192))
    return (rows // 8) * 8


def _plan_time_tiling(T, pad, tile_t, target):
    """Returns (tile_t, pad8, halo_mode) with T % tile_t == 0."""
    pad8 = 0 if pad == 0 else ((pad + 7) // 8) * 8
    step = pad8 if pad else 8

    def mode_for(tt):
        if pad == 0:
            return "none"
        return "zeros" if tt == T else "neighbors"

    # Caller-specified tile (validated), otherwise auto.
    if tile_t is not None:
        ok = (0 < tile_t <= T and T % tile_t == 0
              and (tile_t == T or tile_t % step == 0))
        if ok:
            return tile_t, pad8, mode_for(tile_t)

    if T <= target:
        return T, pad8, mode_for(T)

    cand = (target // step) * step
    while cand >= step:
        if T % cand == 0:
            return cand, pad8, mode_for(cand)
        cand -= step

    # TODO(synk): no suitable divisor of T -> whole-sequence tile; a pl.cdiv
    # grid with a masked tail tile would bound VMEM for long, awkward T.
    return T, pad8, mode_for(T)


# ----------------------------------------------------------------------------
# Wrappers
# ----------------------------------------------------------------------------
def dilated_residual_layer_ntc(x_ntc, mask_nt1, params, dilation, *,
                               tile_t=None, x_buffers=None):
    """DilatedResidualLayer.forward, NTC layout end-to-end (the hot path).

    x_ntc:    (N, T, C)       activations (f32 or bf16)
    mask_nt1: (N, T, 1)       mask[:, 0:1, :] transposed once per stage
    """
    N, T, C = x_ntc.shape
    ksize = params["ksize"]
    pad = int(dilation + dilation * (ksize - 3) / 2)   # same formula as PyTorch
    assert T + 2 * pad - dilation * (ksize - 1) == T, (
        "padding formula only yields 'same' length for odd kernel sizes")

    itemsize = jnp.dtype(x_ntc.dtype).itemsize
    vmem_cap = _vmem_capacity_bytes()
    target = _target_rows(C, ksize, itemsize, vmem_cap)
    tile_t, pad8, halo_mode = _plan_time_tiling(T, pad, tile_t, target)
    nt = T // tile_t

    kernel = functools.partial(
        _dilated_residual_kernel, dilation=dilation, ksize=ksize, pad=pad,
        pad8=pad8, tile_t=tile_t, halo_mode=halo_mode)

    if x_buffers is None:
        x_spec = pl.BlockSpec((1, tile_t, C), lambda n, t: (n, t, 0))
    else:  # v5e tuning knob: deeper pipelining on the main x stream
        x_spec = pl.BlockSpec((1, tile_t, C), lambda n, t: (n, t, 0),
                              pipeline_mode=pl.Buffered(x_buffers))

    in_specs = [x_spec]
    operands = [x_ntc]
    if halo_mode == "neighbors":
        # Halo-only blocks: only pad8 rows from each neighbour tile (x DMA'd
        # ~(1 + 2*pad8/tile_t)x instead of 3x).  Clamped at the sequence ends;
        # the clamped rows are replaced by zeros inside the kernel.
        r = tile_t // pad8
        last = T // pad8 - 1
        in_specs += [
            pl.BlockSpec((1, pad8, C),
                         lambda n, t: (n, jnp.maximum(t * r - 1, 0), 0)),
            pl.BlockSpec((1, pad8, C),
                         lambda n, t: (n, jnp.minimum((t + 1) * r, last), 0)),
        ]
        operands += [x_ntc, x_ntc]
    in_specs += [
        pl.BlockSpec((ksize * C, C), lambda n, t: (0, 0)),     # fused tap slab
        pl.BlockSpec((1, C), lambda n, t: (0, 0)),             # bd
        pl.BlockSpec((C, C), lambda n, t: (0, 0)),             # w1
        pl.BlockSpec((1, C), lambda n, t: (0, 0)),             # b1
        pl.BlockSpec((1, tile_t, 1), lambda n, t: (n, t, 0)),  # mask[:, 0:1, :]^T
    ]
    operands += [params["w_slab"], params["bd"], params["w1"], params["b1"],
                 mask_nt1]

    return pl.pallas_call(
        kernel,
        out_shape=jax.ShapeDtypeStruct((N, T, C), x_ntc.dtype),
        grid=(N, nt),
        in_specs=in_specs,
        out_specs=pl.BlockSpec((1, tile_t, C), lambda n, t: (n, t, 0)),
        compiler_params=pltpu.CompilerParams(
            dimension_semantics=("parallel", "parallel"),
            vmem_limit_bytes=int(vmem_cap * 0.85)),
    )(*operands)


def dilated_residual_layer_nct(x_nct, mask_nct, params, dilation, **kw):
    """Drop-in wrapper for PyTorch's NCT layout.

    NOT the hot path: it adds two full HBM transpose passes.  Production
    MS-TCN stacks should convert to NTC once per stage and call
    dilated_residual_layer_ntc per layer.
    """
    x_ntc = jnp.transpose(x_nct, (0, 2, 1))                    # NCT -> NTC
    m_nt1 = jnp.transpose(mask_nct[:, 0:1, :], (0, 2, 1))      # (N, T, 1)
    y_ntc = dilated_residual_layer_ntc(x_ntc, m_nt1, params, dilation, **kw)
    return jnp.transpose(y_ntc, (0, 2, 1))                     # NTC -> NCT


# ----------------------------------------------------------------------------
# Pure-JAX reference (mirrors PyTorch semantics, NCT layout) for validation.
# ----------------------------------------------------------------------------
def _conv1d_ref(x_nct, w_oik, b, padding, dilation):
    y = jax.lax.conv_general_dilated(
        x_nct, w_oik, window_strides=(1,), padding=[(padding, padding)],
        rhs_dilation=(dilation,), dimension_numbers=("NCH", "OIH", "NCH"))
    return y + b[None, :, None]


def reference_forward(x_nct, mask_nct, wd, bd, w1, b1, dilation, kernel_size):
    pad = int(dilation + dilation * (kernel_size - 3) / 2)
    h = jax.nn.relu(_conv1d_ref(x_nct, wd, bd, pad, dilation))
    h = _conv1d_ref(h, w1, b1, 0, 1)
    return (x_nct + h) * mask_nct[:, 0:1, :]


# ----------------------------------------------------------------------------
if __name__ == "__main__":
    N, C, T = 2, 32, 256

    key = jax.random.PRNGKey(0)
    kx, km = jax.random.split(key, 2)
    x_nct = jax.random.normal(kx, (N, C, T), jnp.float32)
    mask_nct = (jax.random.uniform(km, (N, C, T)) > 0.2).astype(jnp.float32)

    # NTC-resident activations / mask: prepared ONCE (test scaffolding — in a
    # real MS-TCN stage the whole stack stays NTC so this never hits the hot path).
    x_ntc = jnp.transpose(x_nct, (0, 2, 1))
    mask_nt1 = jnp.transpose(mask_nct[:, 0:1, :], (0, 2, 1))

    def make_params(K, seed):
        ks = jax.random.split(jax.random.PRNGKey(seed), 4)
        s = 0.1
        wd = s * jax.random.normal(ks[0], (C, C, K), jnp.float32)
        bd = s * jax.random.normal(ks[1], (C,), jnp.float32)
        w1 = s * jax.random.normal(ks[2], (C, C, 1), jnp.float32)
        b1 = s * jax.random.normal(ks[3], (C,), jnp.float32)
        return wd, bd, w1, b1

    # (kernel_size, dilation, tile_t): exercise halo-only neighbour tiles
    # (pad < 8, pad == 8, pad == 16), the single-tile path, and pad == 0.
    cases = [(3, 1, 64), (3, 8, 64), (3, 16, 64), (3, 4, None), (1, 1, None)]
    for K, dilation, tile_t in cases:
        wd, bd, w1, b1 = make_params(K, 7 * K + dilation)
        params = prepare_layer_params(wd, bd, w1, b1)   # off the hot path
        y_ntc = dilated_residual_layer_ntc(x_ntc, mask_nt1, params, dilation,
                                           tile_t=tile_t)
        y_ntc = jax.block_until_ready(y_ntc)
        assert y_ntc.shape == (N, T, C)
        ref = reference_forward(x_nct, mask_nct, wd, bd, w1, b1, dilation, K)
        np.testing.assert_allclose(
            np.asarray(jnp.transpose(y_ntc, (0, 2, 1))), np.asarray(ref),
            rtol=2e-3, atol=2e-3)

    # bf16 HBM residency (halves HBM bytes; f32 accumulation inside the kernel).
    K, dilation = 3, 2
    wd, bd, w1, b1 = make_params(K, 99)
    params_bf = prepare_layer_params(
        wd.astype(jnp.bfloat16), bd.astype(jnp.bfloat16),
        w1.astype(jnp.bfloat16), b1.astype(jnp.bfloat16))
    y_bf = dilated_residual_layer_ntc(
        x_ntc.astype(jnp.bfloat16), mask_nt1.astype(jnp.bfloat16),
        params_bf, dilation, tile_t=64)
    y_bf = jax.block_until_ready(y_bf)
    ref = reference_forward(x_nct, mask_nct, wd, bd, w1, b1, dilation, K)
    np.testing.assert_allclose(
        np.asarray(jnp.transpose(y_bf, (0, 2, 1))).astype(np.float32),
        np.asarray(ref), rtol=6e-2, atol=6e-2)

    # NCT drop-in compatibility wrapper (not the hot path) smoke test.
    wd, bd, w1, b1 = make_params(3, 11)
    params = prepare_layer_params(wd, bd, w1, b1)
    y_nct = jax.block_until_ready(
        dilated_residual_layer_nct(x_nct, mask_nct, params, 4))
    ref = reference_forward(x_nct, mask_nct, wd, bd, w1, b1, 4, 3)
    np.testing.assert_allclose(np.asarray(y_nct), np.asarray(ref),
                               rtol=2e-3, atol=2e-3)

    print("KERNEL_OK")
</pallas_src>

<mosaic_0001>
module attributes {stable_mosaic.version = 11 : i64} {
  func.func @_dilated_residual_kernel(%arg0: i32, %arg1: i32, %arg2: memref<1x64x32xf32, #tpu.memory_space<vmem>>, %arg3: memref<1x8x32xf32, #tpu.memory_space<vmem>>, %arg4: memref<1x8x32xf32, #tpu.memory_space<vmem>>, %arg5: memref<96x32xf32, #tpu.memory_space<vmem>>, %arg6: memref<1x32xf32, #tpu.memory_space<vmem>>, %arg7: memref<32x32xf32, #tpu.memory_space<vmem>>, %arg8: memref<1x32xf32, #tpu.memory_space<vmem>>, %arg9: memref<1x64x1xf32, #tpu.memory_space<vmem>>, %arg10: memref<1x64x32xf32, #tpu.memory_space<vmem>>) attributes {dimension_semantics = [#tpu.dimension_semantics<parallel>, #tpu.dimension_semantics<parallel>], iteration_bounds = array<i64: 2, 4>, scalar_prefetch = 0 : i64, scratch_operands = 0 : i64, tpu.core_type = #tpu.core_type<tc>, window_params = [{transform_indices = @transform_0, window_bounds = array<i64: 1, 64, 32>}, {transform_indices = @transform_1, window_bounds = array<i64: 1, 8, 32>}, {transform_indices = @transform_2, window_bounds = array<i64: 1, 8, 32>}, {pipeline_mode = #tpu.pipeline_mode<synchronous>, transform_indices = @transform_3, window_bounds = array<i64: 96, 32>}, {pipeline_mode = #tpu.pipeline_mode<synchronous>, transform_indices = @transform_4, window_bounds = array<i64: 1, 32>}, {pipeline_mode = #tpu.pipeline_mode<synchronous>, transform_indices = @transform_5, window_bounds = array<i64: 32, 32>}, {pipeline_mode = #tpu.pipeline_mode<synchronous>, transform_indices = @transform_6, window_bounds = array<i64: 1, 32>}, {transform_indices = @transform_7, window_bounds = array<i64: 1, 64, 1>}, {transform_indices = @transform_8, window_bounds = array<i64: 1, 64, 32>}]} {
    %c0 = arith.constant 0 : index
    %c0_0 = arith.constant 0 : index
    %c0_1 = arith.constant 0 : index
    %0 = vector.load %arg2[%c0, %c0_0, %c0_1] : memref<1x64x32xf32, #tpu.memory_space<vmem>>, vector<1x64x32xf32>
    %1 = vector.shape_cast %0 : vector<1x64x32xf32> to vector<64x32xf32>
    %cst = arith.constant 0.000000e+00 : f32
    %2 = vector.broadcast %cst : f32 to vector<1x32xf32>
    %c0_2 = arith.constant 0 : index
    %c0_3 = arith.constant 0 : index
    %c0_4 = arith.constant 0 : index
    %3 = vector.load %arg3[%c0_2, %c0_3, %c0_4] : memref<1x8x32xf32, #tpu.memory_space<vmem>>, vector<1x8x32xf32>
    %4 = vector.shape_cast %3 : vector<1x8x32xf32> to vector<8x32xf32>
    %5 = vector.extract_strided_slice %4 {offsets = [7, 0], sizes = [1, 32], strides = [1, 1]} : vector<8x32xf32> to vector<1x32xf32>
    %c0_5 = arith.constant 0 : index
    %c0_6 = arith.constant 0 : index
    %c0_7 = arith.constant 0 : index
    %6 = vector.load %arg4[%c0_5, %c0_6, %c0_7] : memref<1x8x32xf32, #tpu.memory_space<vmem>>, vector<1x8x32xf32>
    %7 = vector.shape_cast %6 : vector<1x8x32xf32> to vector<8x32xf32>
    %8 = vector.extract_strided_slice %7 {offsets = [0, 0], sizes = [1, 32], strides = [1, 1]} : vector<8x32xf32> to vector<1x32xf32>
    %c0_i32 = arith.constant 0 : i32
    %9 = arith.cmpi sgt, %arg1, %c0_i32 : i32
    %10 = arith.select %9, %5, %2 : vector<1x32xf32>
    %c3_i32 = arith.constant 3 : i32
    %11 = arith.cmpi slt, %arg1, %c3_i32 : i32
    %12 = arith.select %11, %8, %2 : vector<1x32xf32>
    %13 = tpu.concatenate %10, %1, %12 in 0 : vector<1x32xf32>, vector<64x32xf32>, vector<1x32xf32> -> vector<66x32xf32>
    %14 = vector.extract_strided_slice %13 {offsets = [0, 0], sizes = [64, 32], strides = [1, 1]} : vector<66x32xf32> to vector<64x32xf32>
    %15 = vector.extract_strided_slice %13 {offsets = [1, 0], sizes = [64, 32], strides = [1, 1]} : vector<66x32xf32> to vector<64x32xf32>
    %16 = vector.extract_strided_slice %13 {offsets = [2, 0], sizes = [64, 32], strides = [1, 1]} : vector<66x32xf32> to vector<64x32xf32>
    %17 = tpu.concatenate %14, %15, %16 in 1 : vector<64x32xf32>, vector<64x32xf32>, vector<64x32xf32> -> vector<64x96xf32>
    %c0_8 = arith.constant 0 : index
    %c0_9 = arith.constant 0 : index
    %18 = vector.load %arg5[%c0_8, %c0_9] : memref<96x32xf32, #tpu.memory_space<vmem>>, vector<96x32xf32>
    %cst_10 = arith.constant dense<0.000000e+00> : vector<64x32xf32>
    %19 = tpu.matmul %17, %18, %cst_10 {dimension_numbers = #tpu.dot_dimension_numbers<[1], [0], [0], [1], [0, 0, 1, 1], [], []>} : vector<64x96xf32>, vector<96x32xf32>, vector<64x32xf32> -> vector<64x32xf32>
    %c0_11 = arith.constant 0 : index
    %c0_12 = arith.constant 0 : index
    %20 = vector.load %arg6[%c0_11, %c0_12] : memref<1x32xf32, #tpu.memory_space<vmem>>, vector<1x32xf32>
    %21 = vector.broadcast %20 : vector<1x32xf32> to vector<64x32xf32>
    %22 = arith.addf %19, %21 : vector<64x32xf32>
    %cst_13 = arith.constant 0.000000e+00 : f32
    %23 = vector.broadcast %cst_13 : f32 to vector<64x32xf32>
    %24 = arith.maximumf %22, %23 : vector<64x32xf32>
    %c0_14 = arith.constant 0 : index
    %c0_15 = arith.constant 0 : index
    %25 = vector.load %arg7[%c0_14, %c0_15] : memref<32x32xf32, #tpu.memory_space<vmem>>, vector<32x32xf32>
    %cst_16 = arith.constant dense<0.000000e+00> : vector<64x32xf32>
    %26 = tpu.matmul %24, %25, %cst_16 {dimension_numbers = #tpu.dot_dimension_numbers<[1], [0], [0], [1], [0, 0, 1, 1], [], []>} : vector<64x32xf32>, vector<32x32xf32>, vector<64x32xf32> -> vector<64x32xf32>
    %c0_17 = arith.constant 0 : index
    %c0_18 = arith.constant 0 : index
    %27 = vector.load %arg8[%c0_17, %c0_18] : memref<1x32xf32, #tpu.memory_space<vmem>>, vector<1x32xf32>
    %28 = vector.broadcast %27 : vector<1x32xf32> to vector<64x32xf32>
    %29 = arith.addf %26, %28 : vector<64x32xf32>
    %30 = arith.addf %1, %29 : vector<64x32xf32>
    %c0_19 = arith.constant 0 : index
    %c0_20 = arith.constant 0 : index
    %c0_21 = arith.constant 0 : index
    %31 = vector.load %arg9[%c0_19, %c0_20, %c0_21] : memref<1x64x1xf32, #tpu.memory_space<vmem>>, vector<1x64x1xf32>
    %32 = vector.shape_cast %31 : vector<1x64x1xf32> to vector<64x1xf32>
    %33 = vector.broadcast %32 : vector<64x1xf32> to vector<64x32xf32>
    %34 = arith.mulf %30, %33 : vector<64x32xf32>
    %c0_22 = arith.constant 0 : index
    %c0_23 = arith.constant 0 : index
    %c0_24 = arith.constant 0 : index
    %35 = vector.load %arg10[%c0_22, %c0_23, %c0_24] : memref<1x64x32xf32, #tpu.memory_space<vmem>>, vector<1x64x32xf32>
    %36 = vector.shape_cast %35 : vector<1x64x32xf32> to vector<64x32xf32>
    %37 = vector.shape_cast %34 : vector<64x32xf32> to vector<1x64x32xf32>
    tpu.vector_store %arg10[%c0_22, %c0_23, %c0_24], %37 {strides = array<i32>} : memref<1x64x32xf32, #tpu.memory_space<vmem>>, vector<1x64x32xf32>,
    return
  }
  func.func @transform_0(%arg0: i32, %arg1: i32) -> (i32, i32, i32) {
    %c0_i32 = arith.constant 0 : i32
    %c0_i32_0 = arith.constant 0 : i32
    return %arg0, %arg1, %c0_i32 : i32, i32, i32
  }
  func.func @transform_1(%arg0: i32, %arg1: i32) -> (i32, i32, i32) {
    %c8_i32 = arith.constant 8 : i32
    %0 = arith.muli %arg1, %c8_i32 : i32
    %c1_i32 = arith.constant 1 : i32
    %1 = arith.subi %0, %c1_i32 : i32
    %c0_i32 = arith.constant 0 : i32
    %2 = arith.maxsi %1, %c0_i32 : i32
    %c0_i32_0 = arith.constant 0 : i32
    %c0_i32_1 = arith.constant 0 : i32
    return %arg0, %2, %c0_i32_0 : i32, i32, i32
  }
  func.func @transform_2(%arg0: i32, %arg1: i32) -> (i32, i32, i32) {
    %c1_i32 = arith.constant 1 : i32
    %0 = arith.addi %arg1, %c1_i32 : i32
    %c8_i32 = arith.constant 8 : i32
    %1 = arith.muli %0, %c8_i32 : i32
    %c31_i32 = arith.constant 31 : i32
    %2 = arith.minsi %1, %c31_i32 : i32
    %c0_i32 = arith.constant 0 : i32
    %c0_i32_0 = arith.constant 0 : i32
    return %arg0, %2, %c0_i32 : i32, i32, i32
  }
  func.func @transform_3(%arg0: i32, %arg1: i32) -> (i32, i32) {
    %c0_i32 = arith.constant 0 : i32
    %c0_i32_0 = arith.constant 0 : i32
    %c0_i32_1 = arith.constant 0 : i32
    return %c0_i32, %c0_i32_0 : i32, i32
  }
  func.func @transform_4(%arg0: i32, %arg1: i32) -> (i32, i32) {
    %c0_i32 = arith.constant 0 : i32
    %c0_i32_0 = arith.constant 0 : i32
    %c0_i32_1 = arith.constant 0 : i32
    return %c0_i32, %c0_i32_0 : i32, i32
  }
  func.func @transform_5(%arg0: i32, %arg1: i32) -> (i32, i32) {
    %c0_i32 = arith.constant 0 : i32
    %c0_i32_0 = arith.constant 0 : i32
    %c0_i32_1 = arith.constant 0 : i32
    return %c0_i32, %c0_i32_0 : i32, i32
  }
  func.func @transform_6(%arg0: i32, %arg1: i32) -> (i32, i32) {
    %c0_i32 = arith.constant 0 : i32
    %c0_i32_0 = arith.constant 0 : i32
    %c0_i32_1 = arith.constant 0 : i32
    return %c0_i32, %c0_i32_0 : i32, i32
  }
  func.func @transform_7(%arg0: i32, %arg1: i32) -> (i32, i32, i32) {
    %c0_i32 = arith.constant 0 : i32
    %c0_i32_0 = arith.constant 0 : i32
    return %arg0, %arg1, %c0_i32 : i32, i32, i32
  }
  func.func @transform_8(%arg0: i32, %arg1: i32) -> (i32, i32, i32) {
    %c0_i32 = arith.constant 0 : i32
    %c0_i32_0 = arith.constant 0 : i32
    return %arg0, %arg1, %c0_i32 : i32, i32, i32
  }
}

</mosaic_0001>

<bundles_post_ra>
// kernel: tpu_custom_call.1
= control target key start
LH: loop header
LB: loop body
LE: loop exit
PB: predicated region body
PF: predicated region fallthrough
CT: control target
= control target key end

     0   :  { %s1499_s27 = smov 0   ;;  %s1501_s28 = smov 0   ;;  %s1819_s0 = inlined_call_operand.vmem [shape: f32[2,256,32], index: 0, kind: input, shape index: {}]   ;;  %s1820_s1 = inlined_call_operand.vmem [shape: f32[2,256,32], index: 1, kind: input, shape index: {}]   ;;  %s1821_s2 = inlined_call_operand.vmem [shape: f32[2,256,32], index: 2, kind: input, shape index: {}]   ;;  %s1822_s3 = inlined_call_operand.vmem [shape: f32[96,32], index: 3, kind: input, shape index: {}]   ;;  %s1823_s4 = inlined_call_operand.vmem [shape: f32[1,32], index: 4, kind: input, shape index: {}]   ;;  %s1824_s5 = inlined_call_operand.vmem [shape: f32[32,32], index: 5, kind: input, shape index: {}]   ;;  %s1825_s6 = inlined_call_operand.vmem [shape: f32[1,32], index: 6, kind: input, shape index: {}]   ;;  %s1826_s7 = inlined_call_operand.vmem [shape: f32[2,256,1], index: 7, kind: input, shape index: {}]   ;;  %s1827_s8 = inlined_call_operand.vmem [shape: f32[2,256,32], index: 8, kind: output, shape index: {}]  }
   0x1   :  { %s1503_s29 = smov 0   ;;  %s1505_s30 = smov 0  }
   0x2   :  { %s1507_s9 = smov 0  }
   0x3 LB: > { %s27_s10 = sadd.s32 1, %s1441_s29  ;;  %s30_s11 = sadd.s32 1, %s1445_s30  ;;  %s1449_s9 = sphi %s1507_s9, %s18_s9   ;;  %s1445_s30 = sphi %s1505_s30, %s1832_s30   ;;  %s1441_s29 = sphi %s1503_s29, %s1831_s29   ;;  %s1437_s28 = sphi %s1501_s28, %s1830_s28   ;;  %s1433_s27 = sphi %s1499_s27, %s1829_s27  }
   0x4   : > { %p28_p0 = scmp.ge.s32.totalorder %s27_s10, 4  ;;  %p1187_p1 = scmp.ge.s32.totalorder %s1449_s9, 1 }
   0x5   : > { %p362_p2 = scmp.lt.s32.totalorder %s1449_s9, 9 }
   0x6   : > { %s1834_s10 = smov (%p28_p0, %s27_s10), 0  ;;  %s1836_s11 = smov (!%p28_p0, %s30_s11), %s1445_s30 }
   0x7   : > { %p363_p3 = pnand %p1187_p1, %p362_p2  ;;  %p32_p4 = scmp.ge.s32.totalorder %s1836_s11, 2 }
   0x8   : > { %s1532_s12 = sshll.u32 (!%p363_p3), %s1433_s27, 3  ;;  %p438_p5 = scmp.lt.s32.totalorder (!%p363_p3), %s1437_s28, 1  ;;  %v664_v0 = vld [vmem:[%s1822_s3] sm:$0xff] (!%p363_p3)  ;;  %v665_v1 = vld [vmem:[%s1822_s3 + $0x8] sm:$0xff] (!%p363_p3)  ;;  %v666_v2 = vld [vmem:[%s1822_s3 + $0x10] sm:$0xff] (!%p363_p3)  ;;  %vm530_vm0 = vcmask (!%p363_p3), 1040384  }
   0x9   : > { %s1838_s11 = smov (%p32_p4, %s1836_s11), 0  ;;  %366 = sbr.rel (%p363_p3) target bundleno = 612 (0x264), region = 52 }
   0xa   : > { %p440_p6 = scmp.lt.s32.totalorder (!%p363_p3), %s1532_s12, 31  ;;  %v667_v3 = vld [vmem:[%s1822_s3 + $0x18] sm:$0xff] (!%p363_p3)  ;;  %v1328_v4 = vpack.c.bf16 (!%p363_p3), %v665_v1, %v664_v0  ;;  %v668_v6 = vld [vmem:[%s1822_s3 + $0x20] sm:$0xff] (!%p363_p3)  ;;  %v669_v7 = vld [vmem:[%s1822_s3 + $0x28] sm:$0xff] (!%p363_p3)  ;;  %s1192_s14 = sadd.s32 (!%p363_p3), 4294967295, %s1532_s12  ;;  %vm604_vm1 = vcmask (!%p363_p3), 1045504  }
   0xb   : > { %v1332_v5 = vpack.c.bf16 (!%p363_p3), %v667_v3, %v666_v2  ;;  %p449_p7 = scmp.gt.s32.totalorder (!%p363_p3), %s1192_s14, 0  ;;  %v1336_v8 = vpack.c.bf16 (!%p363_p3), %v669_v7, %v668_v6  ;;  %p1193_p8 = scmp.lt.s32.totalorder (!%p363_p3), %s1192_s14, 31  ;;  %v670_v9 = vld [vmem:[%s1822_s3 + $0x30] sm:$0xff] (!%p363_p3)  ;;  %v671_v10 = vld [vmem:[%s1822_s3 + $0x38] sm:$0xff] (!%p363_p3)  ;;  %v672_v22 = vld [vmem:[%s1822_s3 + $0x40] sm:$0xff] (!%p363_p3)  ;;  %vm562_vm2 = vcmask (!%p363_p3), 1046528  }
   0xc   : > { %1329 = vmatprep.subr.bf16.mxu0 (!%p363_p3), %v1328_v4  ;;  %p509_p9 = scmp.gt.s32.totalorder (!%p363_p3), %s1433_s27, 0  ;;  %v1340_v21 = vpack.c.bf16 (!%p363_p3), %v671_v10, %v670_v9  ;;  %v673_v23 = vld [vmem:[%s1822_s3 + $0x48] sm:$0xff] (!%p363_p3)  ;;  %s1239_s16 = sadd.s32 (!%p363_p3), 8, %s1532_s12  ;;  %v674_v44 = vld [vmem:[%s1822_s3 + $0x50] sm:$0xff] (!%p363_p3)  ;;  %v675_v45 = vld [vmem:[%s1822_s3 + $0x58] sm:$0xff] (!%p363_p3)  ;;  %vm646_vm3 = vcmask (!%p363_p3), 261120  }
   0xd   : > { %1331 = vmatpush3.bf16.msra.mxu0 (!%p363_p3), %v1328_v4  ;;  %v1344_v33 = vpack.c.bf16 (!%p363_p3), %v673_v23, %v672_v22  ;;  %p1633_p10 = scmp.lt.s32.totalorder (!%p363_p3), %s1239_s16, 31  ;;  %p514_p11 = scmp.lt.s32.totalorder (!%p363_p3), %s1433_s27, 3  ;;  %v1348_v49 = vpack.c.bf16 (!%p363_p3), %v675_v45, %v674_v44  ;;  %vm655_vm4 = vcmask (!%p363_p3), 523264   ;;  %vm683_vm5 = vcmask (!%p363_p3), 785408  }
   0xe   : > { %1333 = vmatprep.subr.bf16.mxu0 (!%p363_p3), %v1332_v5 }
  0x10   : > { %s1840_s28 = smov (!%p438_p5, %s1437_s28), 1  ;;  %s1844_s16 = smov (!%p1633_p10, %s1239_s16), 31 }
  0x11   : > { %s441_s21 = scalar_select %p440_p6, %s1532_s12, 31  ;;  %1335 = vmatpush3.bf16.msra.mxu0 %v1332_v5 }
  0x12   : > { %s1554_s26 = sshll.u32 %s1840_s28, 5  ;;  %1337 = vmatprep.subr.bf16.mxu0 %v1336_v8  ;;  %s1846_s16 = smov (!%p1633_p10, %s1844_s16), 31 }
  0x13   : > { %s443_s13 = sadd.s32 %s1554_s26, %s441_s21  ;;  %s1451_s21 = smov 64  }
  0x14   : > { %s1558_s15 = sshll.u32 %s443_s13, 3 }
  0x15   : > { %s1564_s18 = scalar_lea.vmem %s1819_s0, %s1558_s15  ;;  %1339 = vmatpush3.bf16.msra.mxu0 %v1336_v8 }
  0x16   : > { %v1573_v11 = vld [vmem:[%s1564_s18] sm:$0xff]  ;;  %v1576_v12 = vld [vmem:[%s1564_s18 + $0x8] sm:$0xff]  ;;  %v1579_v13 = vld [vmem:[%s1564_s18 + $0x10] sm:$0xff]  ;;  %s450_s22 = scalar_select %p449_p7, %s1192_s14, 0  ;;  %1341 = vmatprep.subr.bf16.mxu0 %v1340_v21 }
  0x17   : > { %v531_v14 = vrot.slane %v1573_v11, 7  ;;  %v532_v15 = vrot.slane %v1576_v12, 7  ;;  %v534_v16 = vrot.slane %v1579_v13, 7  ;;  %v1585_v17 = vld [vmem:[%s1564_s18 + $0x18] sm:$0xff]  ;;  %v1588_v18 = vld [vmem:[%s1564_s18 + $0x20] sm:$0xff]  ;;  %v1614_v30 = vld [vmem:[%s1564_s18 + $0x28] sm:$0xff] }
  0x18   : > { %v536_v19 = vrot.slane %v1585_v17, 7  ;;  %v538_v20 = vrot.slane %v1588_v18, 7  ;;  %s1842_s22 = smov (!%p1193_p8, %s450_s22), 31  ;;  %v1631_v38 = vld [vmem:[%s1564_s18 + $0x30] sm:$0xff]  ;;  %v540_v39 = vrot.slane %v1614_v30, 7  ;;  %v1680_v57 = vld [vmem:[%s1564_s18 + $0x38] sm:$0xff]  ;;  %s1779_s18 = scalar_lea.vmem %s1827_s8, %s1558_s15 }
  0x19   : > { %v1603_v24 = vsel %vm530_vm0, %v531_v14, %v532_v15  ;;  %v1606_v25 = vsel %vm530_vm0, %v532_v15, %v534_v16  ;;  %s456_s14 = sadd.s32 %s1842_s22, %s1554_s26  ;;  %s1452_s22 = smov 32   ;;  %v542_v47 = vrot.slane %v1631_v38, 7  ;;  %1343 = vmatpush3.bf16.msra.mxu0 %v1340_v21  ;;  %v544_v63 = vrot.slane %v1680_v57, 7  ;;  %v822_v15 = vld [vmem:[%s1824_s5 + $0x8] sm:$0xff] }
  0x1a   : > { %v606_v26 = vrot.slane %v1603_v24, 2  ;;  %v608_v27 = vrot.slane %v1606_v25, 2  ;;  %v564_v28 = vrot.slane %v1603_v24, 1  ;;  %v566_v29 = vrot.slane %v1606_v25, 1  ;;  %s1199_s17 = sshll.u32 %s456_s14, 3  ;;  %1345 = vmatprep.subr.bf16.mxu0 %v1344_v33 }
  0x1b   : > { %v1618_v31 = vsel %vm530_vm0, %v534_v16, %v536_v19  ;;  %v1621_v32 = vsel %vm530_vm0, %v536_v19, %v538_v20  ;;  %s458_s19 = scalar_lea.vmem %s1820_s1, %s1199_s17  ;;  %v1668_v53 = vsel %vm530_vm0, %v538_v20, %v540_v39  ;;  %s472_s17 = sadd.s32 %s1554_s26, %s1846_s16  ;;  %v1674_v56 = vsel %vm530_vm0, %v540_v39, %v542_v47 }
  0x1c   : > { %v609_v34 = vsel %vm604_vm1, %v606_v26, %v608_v27  ;;  %v567_v35 = vsel %vm562_vm2, %v564_v28, %v566_v29  ;;  %v568_v36 = vrot.slane %v1618_v31, 1  ;;  %v570_v37 = vrot.slane %v1621_v32, 1  ;;  %s1406_s23 = scalar_select %p509_p9, 255, 0 }
  0x1d   : > { %624 = vrot.lane.b32.xlu1 %v609_v34, %s1451_s21  ;;  %582 = vrot.lane.b32.xlu0 %v567_v35, %s1452_s22  ;;  %v610_v42 = vrot.slane %v1618_v31, 2  ;;  %v612_v43 = vrot.slane %v1621_v32, 2  ;;  %s1205_s28 = sshll.u32 %s472_s17, 3  ;;  %v572_v60 = vrot.slane %v1668_v53, 1  ;;  %v574_v61 = vrot.slane %v1674_v56, 1  ;;  %s487_s17 = scalar_lea.vmem %s1826_s7, %s1558_s15 }
  0x1e   : > { %v571_v40 = vsel %vm562_vm2, %v568_v36, %v570_v37  ;;  %v569_v41 = vsel %vm562_vm2, %v566_v29, %v568_v36  ;;  %v1407_v46 = vld [vmem:[%s458_s19] sm:%s1406_s23]  ;;  %1347 = vmatpush3.bf16.msra.mxu0 %v1344_v33  ;;  %s474_s20 = scalar_lea.vmem %s1821_s2, %s1205_s28  ;;  %v614_v3 = vrot.slane %v1668_v53, 2  ;;  %v616_v4 = vrot.slane %v1674_v56, 2 }
  0x1f   : > { %v520_v48 = vrot.slane %v1407_v46, 7  ;;  %v613_v50 = vsel %vm604_vm1, %v610_v42, %v612_v43  ;;  %v611_v51 = vsel %vm604_vm1, %v608_v27, %v610_v42  ;;  %1349 = vmatprep.subr.bf16.mxu0 %v1348_v49  ;;  %s1409_s26 = scalar_select %p514_p11, 255, 0  ;;  %v575_v1 = vsel %vm562_vm2, %v572_v60, %v574_v61 }
  0x20   : > { %v573_v2 = vsel %vm562_vm2, %v570_v37, %v572_v60  ;;  %v545_v5 = vsel %vm530_vm0, %v542_v47, %v544_v63  ;;  %v617_v7 = vsel %vm604_vm1, %v614_v3, %v616_v4  ;;  %v615_v8 = vsel %vm604_vm1, %v612_v43, %v614_v3  ;;  %v972_v3 = vld [vmem:[%s487_s17 + $0x18] sm:$0xff] }
  0x21   : > { %586 = vrot.lane.b32.xlu1 %v571_v40, %s1452_s22  ;;  %584 = vrot.lane.b32.xlu0 %v569_v41, %s1452_s22  ;;  %v1665_v52 = vsel %vm530_vm0, %v520_v48, %v531_v14  ;;  %v1410_v62 = vld [vmem:[%s474_s20] sm:%s1409_s26]  ;;  %v576_v9 = vrot.slane %v545_v5, 1  ;;  %v618_v21 = vrot.slane %v545_v5, 2 }
  0x22   : > { %v605_v54 = vrot.slane %v1665_v52, 2  ;;  %v563_v55 = vrot.slane %v1665_v52, 1  ;;  %1351 = vmatpush3.bf16.msra.mxu0 %v1348_v49  ;;  %v556_v0 = vrot.slane %v1410_v62, 7  ;;  %v821_v14 = vld [vmem:[%s1824_s5] sm:$0xff]  ;;  %v824_v62 = vld [vmem:[%s1824_s5 + $0x18] sm:$0xff] }
  0x23   : > { %v1352_v16 = vpack.c.bf16 %v822_v15, %v821_v14  ;;  %v577_v20 = vsel %vm562_vm2, %v574_v61, %v576_v9  ;;  %v823_v61 = vld [vmem:[%s1824_s5 + $0x10] sm:$0xff] }
  0x24   : > { %v607_v58 = vsel %vm604_vm1, %v605_v54, %v606_v26  ;;  %v565_v59 = vsel %vm562_vm2, %v563_v55, %v564_v28  ;;  %v559_v6 = vsel %vm530_vm0, %v544_v63, %v556_v0  ;;  %v619_v26 = vsel %vm604_vm1, %v616_v4, %v618_v21  ;;  %v970_v0 = vld [vmem:[%s487_s17 + $0x8] sm:$0xff]  ;;  %v973_v4 = vld [vmem:[%s487_s17 + $0x20] sm:$0xff] }
  0x25   : > { %628 = vrot.lane.b32.xlu1 %v613_v50, %s1451_s21  ;;  %626 = vrot.lane.b32.xlu0 %v611_v51, %s1451_s21  ;;  %v578_v10 = vrot.slane %v559_v6, 1  ;;  %v620_v22 = vrot.slane %v559_v6, 2  ;;  %v1356_v63 = vpack.c.bf16 %v824_v62, %v823_v61  ;;  %v975_v6 = vld [vmem:[%s487_s17 + $0x30] sm:$0xff] }
  0x26   : > { %1353 = vmatprep.subr.bf16.mxu1 %v1352_v16 }
  0x27   : > { %v579_v19 = vsel %vm562_vm2, %v576_v9, %v578_v10  ;;  %1355 = vmatpush3.bf16.msra.mxu1 %v1352_v16  ;;  %v621_v23 = vsel %vm604_vm1, %v618_v21, %v620_v22 }
  0x28   : > { %1357 = vmatprep.subr.bf16.mxu1 %v1356_v63 }
  0x29   : > { %622 = vrot.lane.b32.xlu1 %v607_v58, %s1451_s21  ;;  %580 = vrot.lane.b32.xlu0 %v565_v59, %s1452_s22 }
  0x2b   : > { %1359 = vmatpush3.bf16.msra.mxu1 %v1356_v63 }
  0x2d   : > { %590 = vrot.lane.b32.xlu1 %v575_v1, %s1452_s22  ;;  %588 = vrot.lane.b32.xlu0 %v573_v2, %s1452_s22  ;;  %v969_v1 = vld [vmem:[%s487_s17] sm:$0xff]  ;;  %v971_v2 = vld [vmem:[%s487_s17 + $0x10] sm:$0xff] }
  0x31   : > { %632 = vrot.lane.b32.xlu1 %v617_v7, %s1451_s21  ;;  %630 = vrot.lane.b32.xlu0 %v615_v8, %s1451_s21  ;;  %v976_v7 = vld [vmem:[%s487_s17 + $0x38] sm:$0xff]  ;;  %v1212_v8 = vld [vmem:[%s1823_s4] ss:$0 sm:$0xff] }
  0x35   : > { %594 = vrot.lane.b32.xlu1 %v579_v19, %s1452_s22  ;;  %592 = vrot.lane.b32.xlu0 %v577_v20, %s1452_s22 }
  0x39   : > { %636 = vrot.lane.b32.xlu1 %v621_v23, %s1451_s21  ;;  %634 = vrot.lane.b32.xlu0 %v619_v26, %s1451_s21 }
  0x8f   : > { %v625_v27 = vpop.permute.xlu1 %624  ;;  %v583_v28 = vpop.permute.xlu0 %582 }
  0x90   : > { %v648_v36 = vsel %vm646_vm3, %v1603_v24, %v583_v28 }
  0x91   : > { %v657_v43 = vsel %vm655_vm4, %v648_v36, %v625_v27 }
  0x93   : > { %v587_v29 = vpop.permute.xlu1 %586  ;;  %v585_v33 = vpop.permute.xlu0 %584 }
  0x94   : > { %v649_v42 = vsel %vm646_vm3, %v1606_v25, %v585_v33  ;;  %v650_v46 = vsel %vm646_vm3, %v1618_v31, %v587_v29 }
  0x97   : > { %v629_v34 = vpop.permute.xlu1 %628  ;;  %v627_v35 = vpop.permute.xlu0 %626 }
  0x98   : > { %v658_v44 = vsel %vm655_vm4, %v649_v42, %v627_v35  ;;  %v659_v47 = vsel %vm655_vm4, %v650_v46, %v629_v34 }
  0x9b   : > { %v623_v37 = vpop.permute.xlu1 %622  ;;  %v581_v39 = vpop.permute.xlu0 %580 }
  0x9c   : > { %v647_v40 = vsel %vm646_vm3, %v1665_v52, %v581_v39 }
  0x9d   : > { %v656_v41 = vsel %vm655_vm4, %v647_v40, %v623_v37 }
  0x9e   : > { %1296 = vmatprep.mubr.msk.f32.mxu0 %vm683_vm5, %v656_v41 }
  0x9f   : > { %v591_v45 = vpop.permute.xlu1 %590  ;;  %1297 = vmatmul.mubr.msk.f32.vlgmr.msra.gmra.mrb[0].mxu0 %vm683_vm5, %v657_v43  ;;  %v589_v24 = vpop.permute.xlu0 %588 }
  0xa0   : > { %1299 = vmatprep.mubr.msk.f32.mxu0 %vm683_vm5, %v658_v44  ;;  %v651_v25 = vsel %vm646_vm3, %v1621_v32, %v589_v24  ;;  %v652_v51 = vsel %vm646_vm3, %v1668_v53, %v591_v45  ;;  %v1221_v44 = vld [vmem:[%s1825_s6] ss:$0 sm:$0xff] }
  0xa3   : > { %v633_v48 = vpop.permute.xlu1 %632  ;;  %1300 = vmatmul.mubr.msk.f32.gmra.mrb[2].mxu0 %vm683_vm5, %v659_v47  ;;  %v631_v49 = vpop.permute.xlu0 %630 }
  0xa4   : > { %v660_v50 = vsel %vm655_vm4, %v651_v25, %v631_v49  ;;  %v661_v52 = vsel %vm655_vm4, %v652_v51, %v633_v48 }
  0xa5   : > { %1302 = vmatprep.mubr.msk.f32.mxu0 %vm683_vm5, %v660_v50 }
  0xa7   : > { %v595_v54 = vpop.permute.xlu1 %594  ;;  %1303 = vmatmul.mubr.msk.f32.gmra.mrb[4].mxu0 %vm683_vm5, %v661_v52  ;;  %v593_v31 = vpop.permute.xlu0 %592 }
  0xa8   : > { %v654_v32 = vsel %vm646_vm3, %v545_v5, %v595_v54  ;;  %v653_v55 = vsel %vm646_vm3, %v1674_v56, %v593_v31  ;;  %v1453_v56 = vmov 0   ;;  %v974_v5 = vld [vmem:[%s487_s17 + $0x28] sm:$0xff] }
  0xa9   : > { %1404 = vset.pattern.permute.xlu1 %v1453_v56  ;;  %1403 = vset.pattern.permute.xlu0 %v1453_v56 }
  0xaa   : > { %984 = vperm.xlu1 %1404, %v970_v0   ;;  %979 = vperm.xlu0 %1403, %v969_v1  }
  0xab   : > { %v637_v58 = vpop.permute.xlu1 %636  ;;  %v635_v59 = vpop.permute.xlu0 %634 }
  0xac   : > { %v663_v60 = vsel %vm655_vm4, %v654_v32, %v637_v58  ;;  %v662_v53 = vsel %vm655_vm4, %v653_v55, %v635_v59 }
  0xad   : > { %1305 = vmatprep.mubr.msk.f32.mxu0 %vm683_vm5, %v662_v53 }
  0xae   : > { %1306 = vmatmul.mubr.msk.f32.gmra.mrb[6].mxu0 %vm683_vm5, %v663_v60  ;;  %989 = vperm.xlu1 %1404, %v971_v2  }
  0xaf   : > { %994 = vperm.xlu0 %1403, %v972_v3  }
  0xb2   : > { %999 = vperm.xlu1 %1404, %v973_v4  }
  0xb3   : > { %1004 = vperm.xlu0 %1403, %v974_v5  }
  0xb6   : > { %1009 = vperm.xlu1 %1404, %v975_v6  }
  0xb7   : > { %1014 = vperm.xlu0 %1403, %v976_v7  }
 0x129   : > { %v980_v45 = vpop.permute.xlu0 %979  ;;  %v985_v46 = vpop.permute.xlu1 %984 }
 0x12d   : > { %v990_v59 = vpop.permute.xlu1 %989 }
 0x12e   : > { %v995_v32 = vpop.permute.xlu0 %994 }
 0x131   : > { %v1000_v2 = vpop.permute.xlu1 %999 }
 0x132   : > { %v1005_v1 = vpop.permute.xlu0 %1004 }
 0x172   : > { %v1298_v9 = vpop.f32.mrb[0].mxu0 }
 0x173   : > { %v780_v10 = vadd.f32 %v1298_v9, %v1212_v8  ;;  %v774_v14 = vpop.f32.mrb[1].mxu0 }
 0x174   : > { %v775_v15 = vadd.f32 %v1212_v8, %v774_v14 }
 0x175   : > { %v814_v20 = vmax.f32 %v780_v10, 0.0  ;;  %v1010_v10 = vpop.permute.xlu1 %1009 }
 0x176   : > { %v813_v16 = vmax.f32 %v775_v15, 0.0  ;;  %v1301_v19 = vpop.f32.mrb[2].mxu0 }
 0x177   : > { %v790_v21 = vadd.f32 %v1301_v19, %v1212_v8  ;;  %v784_v22 = vpop.f32.mrb[3].mxu0 }
 0x178   : > { %v785_v23 = vadd.f32 %v1212_v8, %v784_v22  ;;  %1316 = vmatprep.mubr.msk.f32.mxu1 %vm646_vm3, %v813_v16 }
 0x179   : > { %1317 = vmatmul.mubr.msk.f32.vlgmr.msra.gmra.mrb[0].mxu1 %vm646_vm3, %v814_v20  ;;  %v816_v28 = vmax.f32 %v790_v21, 0.0 }
 0x17a   : > { %v815_v26 = vmax.f32 %v785_v23, 0.0  ;;  %v1304_v27 = vpop.f32.mrb[4].mxu0 }
 0x17b   : > { %v800_v29 = vadd.f32 %v1304_v27, %v1212_v8  ;;  %v794_v33 = vpop.f32.mrb[5].mxu0 }
 0x17c   : > { %v795_v34 = vadd.f32 %v1212_v8, %v794_v33  ;;  %1319 = vmatprep.mubr.msk.f32.mxu1 %vm646_vm3, %v815_v26 }
 0x17d   : > { %1320 = vmatmul.mubr.msk.f32.gmra.mrb[2].mxu1 %vm646_vm3, %v816_v28  ;;  %v818_v36 = vmax.f32 %v800_v29, 0.0 }
 0x17e   : > { %v817_v35 = vmax.f32 %v795_v34, 0.0 }
 0x180   : > { %1322 = vmatprep.mubr.msk.f32.mxu1 %vm646_vm3, %v817_v35 }
 0x181   : > { %v1307_v37 = vpop.f32.mrb[6].mxu0  ;;  %1323 = vmatmul.mubr.msk.f32.gmra.mrb[4].mxu1 %vm646_vm3, %v818_v36 }
 0x182   : > { %v810_v39 = vadd.f32 %v1307_v37, %v1212_v8  ;;  %v804_v40 = vpop.f32.mrb[7].mxu0 }
 0x183   : > { %v805_v41 = vadd.f32 %v1212_v8, %v804_v40  ;;  %v1015_v8 = vpop.permute.xlu0 %1014 }
 0x184   : > { %v820_v43 = vmax.f32 %v810_v39, 0.0 }
 0x185   : > { %v819_v42 = vmax.f32 %v805_v41, 0.0 }
 0x187   : > { %1325 = vmatprep.mubr.msk.f32.mxu1 %vm646_vm3, %v819_v42 }
 0x188   : > { %1326 = vmatmul.mubr.msk.f32.gmra.mrb[6].mxu1 %vm646_vm3, %v820_v43 }
 0x24c   : > { %v1318_v24 = vpop.f32.mrb[0].mxu1 }
 0x24d   : > { %v928_v47 = vadd.f32 %v1318_v24, %v1221_v44  ;;  %v922_v25 = vpop.f32.mrb[1].mxu1 }
 0x24e   : > { %v923_v48 = vadd.f32 %v1221_v44, %v922_v25 }
 0x24f   : > { %v962_v49 = vadd.f32 %v928_v47, %v1576_v12 }
 0x250   : > { %v961_v50 = vadd.f32 %v923_v48, %v1573_v11  ;;  %v1321_v51 = vpop.f32.mrb[2].mxu1 }
 0x251   : > { %v1018_v52 = vmul.f32 %v985_v46, %v962_v49  ;;  %v938_v54 = vadd.f32 %v1321_v51, %v1221_v44  ;;  %v932_v31 = vpop.f32.mrb[3].mxu1 }
 0x252   : > { %v1017_v55 = vmul.f32 %v980_v45, %v961_v50  ;;  %v933_v58 = vadd.f32 %v1221_v44, %v932_v31 }
 0x253   : > { %1026 = vst.msk [vmem:[%s1779_s18 + $0x8] sm:$0xff] %vm646_vm3, %v1018_v52  ;;  %v964_v12 = vadd.f32 %v938_v54, %v1585_v17 }
 0x254   : > { %1025 = vst.msk [vmem:[%s1779_s18] sm:$0xff] %vm646_vm3, %v1017_v55  ;;  %v963_v60 = vadd.f32 %v933_v58, %v1579_v13  ;;  %v1324_v11 = vpop.f32.mrb[4].mxu1 }
 0x255   : > { %v1020_v53 = vmul.f32 %v995_v32, %v964_v12  ;;  %v948_v61 = vadd.f32 %v1324_v11, %v1221_v44  ;;  %v942_v62 = vpop.f32.mrb[5].mxu1 }
 0x256   : > { %v1019_v63 = vmul.f32 %v990_v59, %v963_v60  ;;  %v943_v56 = vadd.f32 %v1221_v44, %v942_v62 }
 0x257   : > { %1028 = vst.msk [vmem:[%s1779_s18 + $0x18] sm:$0xff] %vm646_vm3, %v1020_v53  ;;  %v966_v0 = vadd.f32 %v948_v61, %v1614_v30 }
 0x258   : > { %1027 = vst.msk [vmem:[%s1779_s18 + $0x10] sm:$0xff] %vm646_vm3, %v1019_v63  ;;  %v965_v17 = vadd.f32 %v943_v56, %v1588_v18 }
 0x259   : > { %v1022_v13 = vmul.f32 %v1005_v1, %v966_v0 }
 0x25a   : > { %v1021_v3 = vmul.f32 %v1000_v2, %v965_v17 }
 0x25b   : > { %1030 = vst.msk [vmem:[%s1779_s18 + $0x28] sm:$0xff] %vm646_vm3, %v1022_v13  ;;  %v1327_v4 = vpop.f32.mrb[6].mxu1 }
 0x25c   : > { %1029 = vst.msk [vmem:[%s1779_s18 + $0x20] sm:$0xff] %vm646_vm3, %v1021_v3  ;;  %v958_v5 = vadd.f32 %v1327_v4, %v1221_v44  ;;  %v952_v6 = vpop.f32.mrb[7].mxu1 }
 0x25d   : > { %v953_v7 = vadd.f32 %v1221_v44, %v952_v6 }
 0x25e   : > { %v968_v30 = vadd.f32 %v958_v5, %v1680_v57 }
 0x25f   : > { %v967_v9 = vadd.f32 %v953_v7, %v1631_v38 }
 0x260   : > { %v1024_v18 = vmul.f32 %v1015_v8, %v968_v30 }
 0x261   : > { %v1023_v14 = vmul.f32 %v1010_v10, %v967_v9 }
 0x262   : > { %1032 = vst.msk [vmem:[%s1779_s18 + $0x38] sm:$0xff] %vm646_vm3, %v1024_v18 }
 0x263   : > { %1031 = vst.msk [vmem:[%s1779_s18 + $0x30] sm:$0xff] %vm646_vm3, %v1023_v14 }
 0x264 PF: > { %s18_s9 = sadd.s32 1, %s1449_s9   ;;  %s1829_s27 = smov %s1441_s29 }
 0x265   : > { %p15_p12 = scmp.ge.s32.totalorder %s18_s9, 10   ;;  %s1830_s28 = smov %s1445_s30 }
 0x266   : > { %s1831_s29 = smov %s1834_s10  ;;  %s1832_s30 = smov %s1838_s11 }
 0x267   :  { %17 = sbr.rel (!%p15_p12) target bundleno = 3 (0x3), region = 91 }

</bundles_post_ra>
